<compile_context>
chip_gen: v6e
topology: v6e:2x2x1
jax: 0.10.0
libtpu: 0.0.40
codegen_flags: <defaults>
</compile_context>

<pallas_src>
import functools

import jax
import jax.numpy as jnp
from jax.experimental import pallas as pl
from jax.experimental.pallas import tpu as pltpu


def _round_up(n, m):
    return ((n + m - 1) // m) * m


def critic_kernel(x_ref, p_ref, out_ref, *, negative_slope,
                  F, H, H2, o_wih, o_whh, o_w1, o_vec):
    """Whole Critic forward in one kernel (recurrence + MLP head).

    p_ref is a single packed f32 slab of shape (rows, 4H), row layout
    (gate order in the LSTM weights is i, f, o, g):
      [o_wih : o_wih+F]  wih_t  (F, 4H)   LSTM input->gates weight (transposed)
      [o_whh : o_whh+H]  whh_t  (H, 4H)   LSTM hidden->gates weight (transposed)
      [o_w1  : o_w1 +H]  w1_t   (H, H2)   first Linear weight (transposed), lanes [0:H2]
      [o_vec + 0]        b      (1, 4H)   combined LSTM bias (b_ih + b_hh)
      [o_vec + 1]        b1     (1, H2)
      [o_vec + 2]        w2_row (1, H2)   second Linear weight as a row vector
      [o_vec + 3]        b2     (1, 1)

    out_ref : (1, OUT_W) packed output, lanes [0:H] = final hidden h, lane H = sigmoid(critic).
    """
    sl = x_ref.shape[0]

    wih = p_ref[o_wih:o_wih + F, :]                              # (F, 4H)
    whh = p_ref[o_whh:o_whh + H, :]                              # (H, 4H)
    b = p_ref[o_vec:o_vec + 1, :]                                # (1, 4H)

    # Hoisted input projection + folded bias: one (sl, F) x (F, 4H) matmul,
    # off the recurrent critical path.
    pre_gates = (jnp.dot(x_ref[...], wih,
                         preferred_element_type=jnp.float32) + b)  # (sl, 4H)

    h = jnp.zeros((1, H), jnp.float32)
    c = jnp.zeros((1, H), jnp.float32)

    # Fully unrolled recurrence (sl is a static Python int); only the
    # h @ whh matmul + gate nonlinearities remain on the serial chain.
    # (For sl >~ 64 switch to lax.fori_loop(unroll=4/8) with pre_gates in VMEM scratch.)
    for t in range(sl):
        gates = pre_gates[t:t + 1, :] + jnp.dot(
            h, whh, preferred_element_type=jnp.float32)          # (1, 4H)
        sig = jax.nn.sigmoid(gates[:, :3 * H])                   # i, f, o in one EUP pass
        g_g = jnp.tanh(gates[:, 3 * H:])
        i_g = sig[:, 0 * H:1 * H]
        f_g = sig[:, 1 * H:2 * H]
        o_g = sig[:, 2 * H:3 * H]
        c = f_g * c + i_g * g_g
        h = o_g * jnp.tanh(c)

    # MLP head: Linear -> LeakyReLU -> (VPU mul + lane reduce) -> Sigmoid
    w1 = p_ref[o_w1:o_w1 + H, :H2]                               # (H, H2)
    b1 = p_ref[o_vec + 1:o_vec + 2, :H2]                         # (1, H2)
    w2 = p_ref[o_vec + 2:o_vec + 3, :H2]                         # (1, H2)
    b2 = p_ref[o_vec + 3:o_vec + 4, 0:1]                         # (1, 1)

    z1 = jnp.dot(h, w1, preferred_element_type=jnp.float32) + b1
    z1 = jnp.where(z1 >= 0, z1, negative_slope * z1)
    z2 = jnp.sum(z1 * w2, axis=-1, keepdims=True) + b2
    crit = jax.nn.sigmoid(z2)

    # Pack both results into one lane-dense row -> single output store/DMA.
    out_w = out_ref.shape[-1]
    pieces = [h, crit]
    pad_w = out_w - (H + 1)
    if pad_w > 0:
        pieces.append(jnp.zeros((1, pad_w), jnp.float32))
    out_ref[...] = jnp.concatenate(pieces, axis=-1)


def critic_forward(x, slab, meta, negative_slope):
    """x: (seq_len, input_dim) -> (h: (input_dim,), critic_output: (1,)).

    `slab`, `meta` must come from `pack_kernel_params`.
    """
    sl, F = x.shape
    H, H2 = meta["H"], meta["H2"]
    out_w = _round_up(H + 1, 128)

    kernel = functools.partial(critic_kernel, negative_slope=negative_slope, **meta)
    vmem = pl.BlockSpec(memory_space=pltpu.MemorySpace.VMEM)

    # Advisory cost hint so XLA schedules this tiny custom call sensibly.
    flops = 2 * sl * F * 4 * H + 2 * sl * H * 4 * H + 2 * H * H2 + 2 * H2
    transc = sl * 5 * H + 1
    bytes_acc = 4 * (int(x.size) + int(slab.size) + out_w)

    out = pl.pallas_call(
        kernel,
        out_shape=jax.ShapeDtypeStruct((1, out_w), jnp.float32),
        in_specs=[vmem, vmem],
        out_specs=vmem,
        cost_estimate=pl.CostEstimate(flops=flops, transcendentals=transc,
                                      bytes_accessed=bytes_acc),
    )(x, slab)
    return out[0, :H], out[0, H:H + 1]


def make_params(key, input_dim):
    """Deterministic PyTorch-style init (uniform(-1/sqrt(H), 1/sqrt(H))).

    LSTM weights are stored transposed (x @ W^T form) in PyTorch gate order
    (i, f, g, o); `pack_kernel_params` permutes + packs them for the kernel.
    """
    h = input_dim
    h2 = input_dim // 2
    ks = jax.random.split(key, 8)
    bound_lstm = 1.0 / jnp.sqrt(h)
    bound_l1 = 1.0 / jnp.sqrt(h)
    bound_l2 = 1.0 / jnp.sqrt(h2)

    def u(k, shape, b):
        return jax.random.uniform(k, shape, jnp.float32, -b, b)

    wih_t = u(ks[0], (input_dim, 4 * h), bound_lstm)
    whh_t = u(ks[1], (h, 4 * h), bound_lstm)
    b_ih = u(ks[2], (1, 4 * h), bound_lstm)
    b_hh = u(ks[3], (1, 4 * h), bound_lstm)
    w1_t = u(ks[4], (h, h2), bound_l1)
    b1 = u(ks[5], (1, h2), bound_l1)
    w2_t = u(ks[6], (h2, 1), bound_l2)
    b2 = u(ks[7], (1, 1), bound_l2)
    return {"wih_t": wih_t, "whh_t": whh_t, "b": b_ih + b_hh,
            "w1_t": w1_t, "b1": b1, "w2_t": w2_t, "b2": b2}


def pack_kernel_params(params):
    """One-time param prep: permute gates (i,f,g,o)->(i,f,o,g) and pack all
    parameter tensors into a single (rows, 4H) f32 slab (one input DMA).
    Regions are 8-row aligned so matmul operands stay sublane-tile aligned."""
    def perm(w):
        i_g, f_g, g_g, o_g = jnp.split(w, 4, axis=-1)
        return jnp.concatenate([i_g, f_g, o_g, g_g], axis=-1)

    wih_t = perm(params["wih_t"])
    whh_t = perm(params["whh_t"])
    b = perm(params["b"])
    w1_t = params["w1_t"]
    b1 = params["b1"]
    w2_row = params["w2_t"].T                      # (1, H2)
    b2 = params["b2"]

    F, H4 = wih_t.shape
    H = H4 // 4
    H2 = w1_t.shape[1]
    W = H4                                         # slab lane width (=4H, 128 for input_dim=32)

    rF, rH = _round_up(F, 8), _round_up(H, 8)
    o_wih, o_whh, o_w1, o_vec = 0, rF, rF + rH, rF + 2 * rH
    rows = o_vec + 8

    def put(slab, row0, arr):
        r, c = arr.shape
        return slab.at[row0:row0 + r, :c].set(arr)

    slab = jnp.zeros((rows, W), jnp.float32)
    slab = put(slab, o_wih, wih_t)
    slab = put(slab, o_whh, whh_t)
    slab = put(slab, o_w1, w1_t)
    slab = put(slab, o_vec + 0, b)
    slab = put(slab, o_vec + 1, b1)
    slab = put(slab, o_vec + 2, w2_row)
    slab = put(slab, o_vec + 3, b2)

    meta = dict(F=F, H=H, H2=H2, o_wih=o_wih, o_whh=o_whh, o_w1=o_w1, o_vec=o_vec)
    return slab, meta


def critic_reference(x, params, negative_slope):
    """Pure-JAX reference of the same math in PyTorch gate order (i,f,g,o)."""
    h_dim = x.shape[1]
    h = jnp.zeros((1, h_dim), jnp.float32)
    c = jnp.zeros((1, h_dim), jnp.float32)
    for t in range(x.shape[0]):
        gates = x[t:t + 1] @ params["wih_t"] + h @ params["whh_t"] + params["b"]
        i_g = jax.nn.sigmoid(gates[:, :h_dim])
        f_g = jax.nn.sigmoid(gates[:, h_dim:2 * h_dim])
        g_g = jnp.tanh(gates[:, 2 * h_dim:3 * h_dim])
        o_g = jax.nn.sigmoid(gates[:, 3 * h_dim:])
        c = f_g * c + i_g * g_g
        h = o_g * jnp.tanh(c)
    z1 = h @ params["w1_t"] + params["b1"]
    z1 = jnp.where(z1 >= 0, z1, negative_slope * z1)
    crit = jax.nn.sigmoid(z1 @ params["w2_t"] + params["b2"])
    return h[0], crit[0]


if __name__ == "__main__":
    input_dim = 32
    seq_len = 8
    negative_slope = 0.2

    key = jax.random.PRNGKey(0)
    k_x, k_p = jax.random.split(key)
    x = jax.random.normal(k_x, (seq_len, input_dim), jnp.float32)
    params = make_params(k_p, input_dim)
    slab, meta = pack_kernel_params(params)

    h_out, crit_out = critic_forward(x, slab, meta, negative_slope)
    jax.block_until_ready((h_out, crit_out))

    h_ref, crit_ref = critic_reference(x, params, negative_slope)
    assert h_out.shape == (input_dim,) and crit_out.shape == (1,)
    assert jnp.allclose(h_out, h_ref, atol=1e-5, rtol=1e-5)
    assert jnp.allclose(crit_out, crit_ref, atol=1e-5, rtol=1e-5)

    print("KERNEL_OK")
</pallas_src>

<mosaic_0001>
module attributes {stable_mosaic.version = 11 : i64} {
  func.func @critic_kernel(%arg0: memref<8x32xf32, #tpu.memory_space<vmem>>, %arg1: memref<104x128xf32, #tpu.memory_space<vmem>>, %arg2: memref<1x128xf32, #tpu.memory_space<vmem>>) attributes {dimension_semantics = [], scalar_prefetch = 0 : i64, scratch_operands = 0 : i64, tpu.core_type = #tpu.core_type<tc>} {
    %c0 = arith.constant 0 : index
    %c0_0 = arith.constant 0 : index
    %0 = vector.load %arg1[%c0, %c0_0] : memref<104x128xf32, #tpu.memory_space<vmem>>, vector<32x128xf32>
    %c32 = arith.constant 32 : index
    %c0_1 = arith.constant 0 : index
    %1 = vector.load %arg1[%c32, %c0_1] : memref<104x128xf32, #tpu.memory_space<vmem>>, vector<32x128xf32>
    %c96 = arith.constant 96 : index
    %c0_2 = arith.constant 0 : index
    %2 = vector.load %arg1[%c96, %c0_2] : memref<104x128xf32, #tpu.memory_space<vmem>>, vector<1x128xf32>
    %c0_3 = arith.constant 0 : index
    %c0_4 = arith.constant 0 : index
    %3 = vector.load %arg0[%c0_3, %c0_4] : memref<8x32xf32, #tpu.memory_space<vmem>>, vector<8x32xf32>
    %cst = arith.constant dense<0.000000e+00> : vector<8x128xf32>
    %4 = tpu.matmul %3, %0, %cst {dimension_numbers = #tpu.dot_dimension_numbers<[1], [0], [0], [1], [0, 0, 1, 1], [], []>} : vector<8x32xf32>, vector<32x128xf32>, vector<8x128xf32> -> vector<8x128xf32>
    %5 = vector.broadcast %2 : vector<1x128xf32> to vector<8x128xf32>
    %6 = arith.addf %4, %5 : vector<8x128xf32>
    %cst_5 = arith.constant 0.000000e+00 : f32
    %7 = vector.broadcast %cst_5 : f32 to vector<1x32xf32>
    %cst_6 = arith.constant 0.000000e+00 : f32
    %8 = vector.broadcast %cst_6 : f32 to vector<1x32xf32>
    %9 = vector.extract_strided_slice %6 {offsets = [0, 0], sizes = [1, 128], strides = [1, 1]} : vector<8x128xf32> to vector<1x128xf32>
    %cst_7 = arith.constant dense<0.000000e+00> : vector<1x128xf32>
    %10 = tpu.matmul %7, %1, %cst_7 {dimension_numbers = #tpu.dot_dimension_numbers<[1], [0], [0], [1], [0, 0, 1, 1], [], []>} : vector<1x32xf32>, vector<32x128xf32>, vector<1x128xf32> -> vector<1x128xf32>
    %11 = arith.addf %9, %10 : vector<1x128xf32>
    %12 = vector.extract_strided_slice %11 {offsets = [0, 0], sizes = [1, 96], strides = [1, 1]} : vector<1x128xf32> to vector<1x96xf32>
    %13 = arith.negf %12 : vector<1x96xf32>
    %14 = math.exp %13 : vector<1x96xf32>
    %cst_8 = arith.constant 1.000000e+00 : f32
    %15 = vector.broadcast %cst_8 : f32 to vector<1x96xf32>
    %16 = arith.addf %15, %14 : vector<1x96xf32>
    %17 = arith.divf %15, %16 : vector<1x96xf32>
    %18 = vector.extract_strided_slice %11 {offsets = [0, 96], sizes = [1, 32], strides = [1, 1]} : vector<1x128xf32> to vector<1x32xf32>
    %19 = math.tanh %18 : vector<1x32xf32>
    %20 = vector.extract_strided_slice %17 {offsets = [0, 0], sizes = [1, 32], strides = [1, 1]} : vector<1x96xf32> to vector<1x32xf32>
    %21 = vector.extract_strided_slice %17 {offsets = [0, 32], sizes = [1, 32], strides = [1, 1]} : vector<1x96xf32> to vector<1x32xf32>
    %22 = vector.extract_strided_slice %17 {offsets = [0, 64], sizes = [1, 32], strides = [1, 1]} : vector<1x96xf32> to vector<1x32xf32>
    %23 = arith.mulf %21, %8 : vector<1x32xf32>
    %24 = arith.mulf %20, %19 : vector<1x32xf32>
    %25 = arith.addf %23, %24 : vector<1x32xf32>
    %26 = math.tanh %25 : vector<1x32xf32>
    %27 = arith.mulf %22, %26 : vector<1x32xf32>
    %28 = vector.extract_strided_slice %6 {offsets = [1, 0], sizes = [1, 128], strides = [1, 1]} : vector<8x128xf32> to vector<1x128xf32>
    %cst_9 = arith.constant dense<0.000000e+00> : vector<1x128xf32>
    %29 = tpu.matmul %27, %1, %cst_9 {dimension_numbers = #tpu.dot_dimension_numbers<[1], [0], [0], [1], [0, 0, 1, 1], [], []>} : vector<1x32xf32>, vector<32x128xf32>, vector<1x128xf32> -> vector<1x128xf32>
    %30 = arith.addf %28, %29 : vector<1x128xf32>
    %31 = vector.extract_strided_slice %30 {offsets = [0, 0], sizes = [1, 96], strides = [1, 1]} : vector<1x128xf32> to vector<1x96xf32>
    %32 = arith.negf %31 : vector<1x96xf32>
    %33 = math.exp %32 : vector<1x96xf32>
    %cst_10 = arith.constant 1.000000e+00 : f32
    %34 = vector.broadcast %cst_10 : f32 to vector<1x96xf32>
    %35 = arith.addf %34, %33 : vector<1x96xf32>
    %36 = arith.divf %34, %35 : vector<1x96xf32>
    %37 = vector.extract_strided_slice %30 {offsets = [0, 96], sizes = [1, 32], strides = [1, 1]} : vector<1x128xf32> to vector<1x32xf32>
    %38 = math.tanh %37 : vector<1x32xf32>
    %39 = vector.extract_strided_slice %36 {offsets = [0, 0], sizes = [1, 32], strides = [1, 1]} : vector<1x96xf32> to vector<1x32xf32>
    %40 = vector.extract_strided_slice %36 {offsets = [0, 32], sizes = [1, 32], strides = [1, 1]} : vector<1x96xf32> to vector<1x32xf32>
    %41 = vector.extract_strided_slice %36 {offsets = [0, 64], sizes = [1, 32], strides = [1, 1]} : vector<1x96xf32> to vector<1x32xf32>
    %42 = arith.mulf %40, %25 : vector<1x32xf32>
    %43 = arith.mulf %39, %38 : vector<1x32xf32>
    %44 = arith.addf %42, %43 : vector<1x32xf32>
    %45 = math.tanh %44 : vector<1x32xf32>
    %46 = arith.mulf %41, %45 : vector<1x32xf32>
    %47 = vector.extract_strided_slice %6 {offsets = [2, 0], sizes = [1, 128], strides = [1, 1]} : vector<8x128xf32> to vector<1x128xf32>
    %cst_11 = arith.constant dense<0.000000e+00> : vector<1x128xf32>
    %48 = tpu.matmul %46, %1, %cst_11 {dimension_numbers = #tpu.dot_dimension_numbers<[1], [0], [0], [1], [0, 0, 1, 1], [], []>} : vector<1x32xf32>, vector<32x128xf32>, vector<1x128xf32> -> vector<1x128xf32>
    %49 = arith.addf %47, %48 : vector<1x128xf32>
    %50 = vector.extract_strided_slice %49 {offsets = [0, 0], sizes = [1, 96], strides = [1, 1]} : vector<1x128xf32> to vector<1x96xf32>
    %51 = arith.negf %50 : vector<1x96xf32>
    %52 = math.exp %51 : vector<1x96xf32>
    %cst_12 = arith.constant 1.000000e+00 : f32
    %53 = vector.broadcast %cst_12 : f32 to vector<1x96xf32>
    %54 = arith.addf %53, %52 : vector<1x96xf32>
    %55 = arith.divf %53, %54 : vector<1x96xf32>
    %56 = vector.extract_strided_slice %49 {offsets = [0, 96], sizes = [1, 32], strides = [1, 1]} : vector<1x128xf32> to vector<1x32xf32>
    %57 = math.tanh %56 : vector<1x32xf32>
    %58 = vector.extract_strided_slice %55 {offsets = [0, 0], sizes = [1, 32], strides = [1, 1]} : vector<1x96xf32> to vector<1x32xf32>
    %59 = vector.extract_strided_slice %55 {offsets = [0, 32], sizes = [1, 32], strides = [1, 1]} : vector<1x96xf32> to vector<1x32xf32>
    %60 = vector.extract_strided_slice %55 {offsets = [0, 64], sizes = [1, 32], strides = [1, 1]} : vector<1x96xf32> to vector<1x32xf32>
    %61 = arith.mulf %59, %44 : vector<1x32xf32>
    %62 = arith.mulf %58, %57 : vector<1x32xf32>
    %63 = arith.addf %61, %62 : vector<1x32xf32>
    %64 = math.tanh %63 : vector<1x32xf32>
    %65 = arith.mulf %60, %64 : vector<1x32xf32>
    %66 = vector.extract_strided_slice %6 {offsets = [3, 0], sizes = [1, 128], strides = [1, 1]} : vector<8x128xf32> to vector<1x128xf32>
    %cst_13 = arith.constant dense<0.000000e+00> : vector<1x128xf32>
    %67 = tpu.matmul %65, %1, %cst_13 {dimension_numbers = #tpu.dot_dimension_numbers<[1], [0], [0], [1], [0, 0, 1, 1], [], []>} : vector<1x32xf32>, vector<32x128xf32>, vector<1x128xf32> -> vector<1x128xf32>
    %68 = arith.addf %66, %67 : vector<1x128xf32>
    %69 = vector.extract_strided_slice %68 {offsets = [0, 0], sizes = [1, 96], strides = [1, 1]} : vector<1x128xf32> to vector<1x96xf32>
    %70 = arith.negf %69 : vector<1x96xf32>
    %71 = math.exp %70 : vector<1x96xf32>
    %cst_14 = arith.constant 1.000000e+00 : f32
    %72 = vector.broadcast %cst_14 : f32 to vector<1x96xf32>
    %73 = arith.addf %72, %71 : vector<1x96xf32>
    %74 = arith.divf %72, %73 : vector<1x96xf32>
    %75 = vector.extract_strided_slice %68 {offsets = [0, 96], sizes = [1, 32], strides = [1, 1]} : vector<1x128xf32> to vector<1x32xf32>
    %76 = math.tanh %75 : vector<1x32xf32>
    %77 = vector.extract_strided_slice %74 {offsets = [0, 0], sizes = [1, 32], strides = [1, 1]} : vector<1x96xf32> to vector<1x32xf32>
    %78 = vector.extract_strided_slice %74 {offsets = [0, 32], sizes = [1, 32], strides = [1, 1]} : vector<1x96xf32> to vector<1x32xf32>
    %79 = vector.extract_strided_slice %74 {offsets = [0, 64], sizes = [1, 32], strides = [1, 1]} : vector<1x96xf32> to vector<1x32xf32>
    %80 = arith.mulf %78, %63 : vector<1x32xf32>
    %81 = arith.mulf %77, %76 : vector<1x32xf32>
    %82 = arith.addf %80, %81 : vector<1x32xf32>
    %83 = math.tanh %82 : vector<1x32xf32>
    %84 = arith.mulf %79, %83 : vector<1x32xf32>
    %85 = vector.extract_strided_slice %6 {offsets = [4, 0], sizes = [1, 128], strides = [1, 1]} : vector<8x128xf32> to vector<1x128xf32>
    %cst_15 = arith.constant dense<0.000000e+00> : vector<1x128xf32>
    %86 = tpu.matmul %84, %1, %cst_15 {dimension_numbers = #tpu.dot_dimension_numbers<[1], [0], [0], [1], [0, 0, 1, 1], [], []>} : vector<1x32xf32>, vector<32x128xf32>, vector<1x128xf32> -> vector<1x128xf32>
    %87 = arith.addf %85, %86 : vector<1x128xf32>
    %88 = vector.extract_strided_slice %87 {offsets = [0, 0], sizes = [1, 96], strides = [1, 1]} : vector<1x128xf32> to vector<1x96xf32>
    %89 = arith.negf %88 : vector<1x96xf32>
    %90 = math.exp %89 : vector<1x96xf32>
    %cst_16 = arith.constant 1.000000e+00 : f32
    %91 = vector.broadcast %cst_16 : f32 to vector<1x96xf32>
    %92 = arith.addf %91, %90 : vector<1x96xf32>
    %93 = arith.divf %91, %92 : vector<1x96xf32>
    %94 = vector.extract_strided_slice %87 {offsets = [0, 96], sizes = [1, 32], strides = [1, 1]} : vector<1x128xf32> to vector<1x32xf32>
    %95 = math.tanh %94 : vector<1x32xf32>
    %96 = vector.extract_strided_slice %93 {offsets = [0, 0], sizes = [1, 32], strides = [1, 1]} : vector<1x96xf32> to vector<1x32xf32>
    %97 = vector.extract_strided_slice %93 {offsets = [0, 32], sizes = [1, 32], strides = [1, 1]} : vector<1x96xf32> to vector<1x32xf32>
    %98 = vector.extract_strided_slice %93 {offsets = [0, 64], sizes = [1, 32], strides = [1, 1]} : vector<1x96xf32> to vector<1x32xf32>
    %99 = arith.mulf %97, %82 : vector<1x32xf32>
    %100 = arith.mulf %96, %95 : vector<1x32xf32>
    %101 = arith.addf %99, %100 : vector<1x32xf32>
    %102 = math.tanh %101 : vector<1x32xf32>
    %103 = arith.mulf %98, %102 : vector<1x32xf32>
    %104 = vector.extract_strided_slice %6 {offsets = [5, 0], sizes = [1, 128], strides = [1, 1]} : vector<8x128xf32> to vector<1x128xf32>
    %cst_17 = arith.constant dense<0.000000e+00> : vector<1x128xf32>
    %105 = tpu.matmul %103, %1, %cst_17 {dimension_numbers = #tpu.dot_dimension_numbers<[1], [0], [0], [1], [0, 0, 1, 1], [], []>} : vector<1x32xf32>, vector<32x128xf32>, vector<1x128xf32> -> vector<1x128xf32>
    %106 = arith.addf %104, %105 : vector<1x128xf32>
    %107 = vector.extract_strided_slice %106 {offsets = [0, 0], sizes = [1, 96], strides = [1, 1]} : vector<1x128xf32> to vector<1x96xf32>
    %108 = arith.negf %107 : vector<1x96xf32>
    %109 = math.exp %108 : vector<1x96xf32>
    %cst_18 = arith.constant 1.000000e+00 : f32
    %110 = vector.broadcast %cst_18 : f32 to vector<1x96xf32>
    %111 = arith.addf %110, %109 : vector<1x96xf32>
    %112 = arith.divf %110, %111 : vector<1x96xf32>
    %113 = vector.extract_strided_slice %106 {offsets = [0, 96], sizes = [1, 32], strides = [1, 1]} : vector<1x128xf32> to vector<1x32xf32>
    %114 = math.tanh %113 : vector<1x32xf32>
    %115 = vector.extract_strided_slice %112 {offsets = [0, 0], sizes = [1, 32], strides = [1, 1]} : vector<1x96xf32> to vector<1x32xf32>
    %116 = vector.extract_strided_slice %112 {offsets = [0, 32], sizes = [1, 32], strides = [1, 1]} : vector<1x96xf32> to vector<1x32xf32>
    %117 = vector.extract_strided_slice %112 {offsets = [0, 64], sizes = [1, 32], strides = [1, 1]} : vector<1x96xf32> to vector<1x32xf32>
    %118 = arith.mulf %116, %101 : vector<1x32xf32>
    %119 = arith.mulf %115, %114 : vector<1x32xf32>
    %120 = arith.addf %118, %119 : vector<1x32xf32>
    %121 = math.tanh %120 : vector<1x32xf32>
    %122 = arith.mulf %117, %121 : vector<1x32xf32>
    %123 = vector.extract_strided_slice %6 {offsets = [6, 0], sizes = [1, 128], strides = [1, 1]} : vector<8x128xf32> to vector<1x128xf32>
    %cst_19 = arith.constant dense<0.000000e+00> : vector<1x128xf32>
    %124 = tpu.matmul %122, %1, %cst_19 {dimension_numbers = #tpu.dot_dimension_numbers<[1], [0], [0], [1], [0, 0, 1, 1], [], []>} : vector<1x32xf32>, vector<32x128xf32>, vector<1x128xf32> -> vector<1x128xf32>
    %125 = arith.addf %123, %124 : vector<1x128xf32>
    %126 = vector.extract_strided_slice %125 {offsets = [0, 0], sizes = [1, 96], strides = [1, 1]} : vector<1x128xf32> to vector<1x96xf32>
    %127 = arith.negf %126 : vector<1x96xf32>
    %128 = math.exp %127 : vector<1x96xf32>
    %cst_20 = arith.constant 1.000000e+00 : f32
    %129 = vector.broadcast %cst_20 : f32 to vector<1x96xf32>
    %130 = arith.addf %129, %128 : vector<1x96xf32>
    %131 = arith.divf %129, %130 : vector<1x96xf32>
    %132 = vector.extract_strided_slice %125 {offsets = [0, 96], sizes = [1, 32], strides = [1, 1]} : vector<1x128xf32> to vector<1x32xf32>
    %133 = math.tanh %132 : vector<1x32xf32>
    %134 = vector.extract_strided_slice %131 {offsets = [0, 0], sizes = [1, 32], strides = [1, 1]} : vector<1x96xf32> to vector<1x32xf32>
    %135 = vector.extract_strided_slice %131 {offsets = [0, 32], sizes = [1, 32], strides = [1, 1]} : vector<1x96xf32> to vector<1x32xf32>
    %136 = vector.extract_strided_slice %131 {offsets = [0, 64], sizes = [1, 32], strides = [1, 1]} : vector<1x96xf32> to vector<1x32xf32>
    %137 = arith.mulf %135, %120 : vector<1x32xf32>
    %138 = arith.mulf %134, %133 : vector<1x32xf32>
    %139 = arith.addf %137, %138 : vector<1x32xf32>
    %140 = math.tanh %139 : vector<1x32xf32>
    %141 = arith.mulf %136, %140 : vector<1x32xf32>
    %142 = vector.extract_strided_slice %6 {offsets = [7, 0], sizes = [1, 128], strides = [1, 1]} : vector<8x128xf32> to vector<1x128xf32>
    %cst_21 = arith.constant dense<0.000000e+00> : vector<1x128xf32>
    %143 = tpu.matmul %141, %1, %cst_21 {dimension_numbers = #tpu.dot_dimension_numbers<[1], [0], [0], [1], [0, 0, 1, 1], [], []>} : vector<1x32xf32>, vector<32x128xf32>, vector<1x128xf32> -> vector<1x128xf32>
    %144 = arith.addf %142, %143 : vector<1x128xf32>
    %145 = vector.extract_strided_slice %144 {offsets = [0, 0], sizes = [1, 96], strides = [1, 1]} : vector<1x128xf32> to vector<1x96xf32>
    %146 = arith.negf %145 : vector<1x96xf32>
    %147 = math.exp %146 : vector<1x96xf32>
    %cst_22 = arith.constant 1.000000e+00 : f32
    %148 = vector.broadcast %cst_22 : f32 to vector<1x96xf32>
    %149 = arith.addf %148, %147 : vector<1x96xf32>
    %150 = arith.divf %148, %149 : vector<1x96xf32>
    %151 = vector.extract_strided_slice %144 {offsets = [0, 96], sizes = [1, 32], strides = [1, 1]} : vector<1x128xf32> to vector<1x32xf32>
    %152 = math.tanh %151 : vector<1x32xf32>
    %153 = vector.extract_strided_slice %150 {offsets = [0, 0], sizes = [1, 32], strides = [1, 1]} : vector<1x96xf32> to vector<1x32xf32>
    %154 = vector.extract_strided_slice %150 {offsets = [0, 32], sizes = [1, 32], strides = [1, 1]} : vector<1x96xf32> to vector<1x32xf32>
    %155 = vector.extract_strided_slice %150 {offsets = [0, 64], sizes = [1, 32], strides = [1, 1]} : vector<1x96xf32> to vector<1x32xf32>
    %156 = arith.mulf %154, %139 : vector<1x32xf32>
    %157 = arith.mulf %153, %152 : vector<1x32xf32>
    %158 = arith.addf %156, %157 : vector<1x32xf32>
    %159 = math.tanh %158 : vector<1x32xf32>
    %160 = arith.mulf %155, %159 : vector<1x32xf32>
    %c64 = arith.constant 64 : index
    %c0_23 = arith.constant 0 : index
    %161 = vector.load %arg1[%c64, %c0_23] : memref<104x128xf32, #tpu.memory_space<vmem>>, vector<32x16xf32>
    %c97 = arith.constant 97 : index
    %c0_24 = arith.constant 0 : index
    %162 = vector.load %arg1[%c97, %c0_24] : memref<104x128xf32, #tpu.memory_space<vmem>>, vector<1x16xf32>
    %c98 = arith.constant 98 : index
    %c0_25 = arith.constant 0 : index
    %163 = vector.load %arg1[%c98, %c0_25] : memref<104x128xf32, #tpu.memory_space<vmem>>, vector<1x16xf32>
    %c99 = arith.constant 99 : index
    %c0_26 = arith.constant 0 : index
    %164 = vector.load %arg1[%c99, %c0_26] : memref<104x128xf32, #tpu.memory_space<vmem>>, vector<1x1xf32>
    %cst_27 = arith.constant dense<0.000000e+00> : vector<1x16xf32>
    %165 = tpu.matmul %160, %161, %cst_27 {dimension_numbers = #tpu.dot_dimension_numbers<[1], [0], [0], [1], [0, 0, 1, 1], [], []>} : vector<1x32xf32>, vector<32x16xf32>, vector<1x16xf32> -> vector<1x16xf32>
    %166 = arith.addf %165, %162 : vector<1x16xf32>
    %cst_28 = arith.constant 0.000000e+00 : f32
    %167 = vector.broadcast %cst_28 : f32 to vector<1x16xf32>
    %168 = arith.cmpf oge, %166, %167 : vector<1x16xf32>
    %cst_29 = arith.constant 2.000000e-01 : f32
    %169 = vector.broadcast %cst_29 : f32 to vector<1x16xf32>
    %170 = arith.mulf %169, %166 : vector<1x16xf32>
    %171 = arith.select %168, %166, %170 : vector<1x16xi1>, vector<1x16xf32>
    %172 = arith.mulf %171, %163 : vector<1x16xf32>
    %cst_30 = arith.constant dense<0.000000e+00> : vector<1xf32>
    %173 = vector.multi_reduction <add>, %172, %cst_30 [1] : vector<1x16xf32> to vector<1xf32>
    %174 = vector.shape_cast %173 : vector<1xf32> to vector<1x1xf32>
    %175 = arith.addf %174, %164 : vector<1x1xf32>
    %176 = arith.negf %175 : vector<1x1xf32>
    %177 = math.exp %176 : vector<1x1xf32>
    %cst_31 = arith.constant 1.000000e+00 : f32
    %178 = vector.broadcast %cst_31 : f32 to vector<1x1xf32>
    %179 = arith.addf %178, %177 : vector<1x1xf32>
    %180 = arith.divf %178, %179 : vector<1x1xf32>
    %cst_32 = arith.constant 0.000000e+00 : f32
    %181 = vector.broadcast %cst_32 : f32 to vector<1x95xf32>
    %182 = tpu.concatenate %160, %180, %181 in 1 : vector<1x32xf32>, vector<1x1xf32>, vector<1x95xf32> -> vector<1x128xf32>
    %c0_33 = arith.constant 0 : index
    %c0_34 = arith.constant 0 : index
    %183 = vector.load %arg2[%c0_33, %c0_34] : memref<1x128xf32, #tpu.memory_space<vmem>>, vector<1x128xf32>
    tpu.vector_store %arg2[%c0_33, %c0_34], %182 {strides = array<i32>} : memref<1x128xf32, #tpu.memory_space<vmem>>, vector<1x128xf32>,
    return
  }
}

</mosaic_0001>

<bundles_post_ra>
// kernel: tpu_custom_call.1
= control target key start
LH: loop header
LB: loop body
LE: loop exit
PB: predicated region body
PF: predicated region fallthrough
CT: control target
= control target key end

     0   :  { %7 = vsyncpa [#allocation3], 0  ;;  %s1608_s0 = inlined_call_operand.hbm [shape: f32[8,32], index: 0, kind: input, shape index: {}]   ;;  %s1609_s1 = inlined_call_operand.hbm [shape: f32[104,128], index: 1, kind: input, shape index: {}]   ;;  %s1610_s2 = inlined_call_operand.hbm [shape: f32[1,128], index: 2, kind: output, shape index: {}]  }
   0x1   :  { %8 = vsyncpa [#allocation6], 0 }
   0x2   :  { %9 = vsyncpa [#allocation4], 0  ;;  %s1420_s9 = smov [#allocation2]   ;;  %s1421_s11 = smov [#allocation5]  }
   0x3   :  { %s16_s10 = sshll.u32 %s1420_s9, 4  ;;  %s25_s12 = sshll.u32 %s1421_s11, 4  ;;  %s17_s10 = int_to_ptr.vmem [resolvable:$true] %s16_s10  ;;  %s26_s12 = int_to_ptr.vmem [resolvable:$true] %s25_s12 }
   0x4   :  { %s1362_s13 = scalar_lea.vmem %s17_s10, 128  ;;  %p1367_p1 = scmp.lt.s32.totalorder %s17_s10, %s17_s10 }
   0x5   :  { %p1363_p0 = scmp.ne.s32.totalorder %s17_s10, %s1362_s13  ;;  %p1368_p2 = scmp.lt.s32.totalorder %s1362_s13, %s1362_s13 }
   0x7   :  { %p1369_p3 = por %p1368_p2, %p1367_p1 }
   0x9   :  { %p1370_p4 = pnand %p1369_p3, %p1363_p0 }
   0xb   :  { %1373 = shalt.err (!%p1370_p4)
}
   0xc   :  { %19 = dma.hbm_to_vmem [thread:$0]  %s1608_s0, 128, %s17_s10, [#allocation3]  }
   0xd   :  { %s1382_s16 = scalar_lea.vmem %s26_s12, 1664  ;;  %p1387_p6 = scmp.lt.s32.totalorder %s26_s12, %s26_s12 }
   0xe   :  { %p1383_p5 = scmp.ne.s32.totalorder %s26_s12, %s1382_s16  ;;  %p1388_p7 = scmp.lt.s32.totalorder %s1382_s16, %s1382_s16 }
  0x10   :  { %p1389_p8 = por %p1388_p7, %p1387_p6 }
  0x12   :  { %p1390_p9 = pnand %p1389_p8, %p1383_p5 }
  0x14   :  { %1393 = shalt.err (!%p1390_p9)
}
  0x15   :  { %s1422_s17 = smov 128   ;;  %s1423_s18 = smov 8  }
  0x16   :  { %31 = dma.hbm_to_vmem [thread:$0]  %s1609_s1, 1664, %s26_s12, [#allocation6], %s1422_s17, %s1422_s17, %s1423_s18  }
  0x17   :  { %1414 = dma.done.wait [#allocation3], 128  }
  0x18   :  { %1415 = vsyncadd [#allocation3], 4294967168 }
  0x19   :  { %1416 = dma.done.wait [#allocation6], 1664  }
  0x1a   :  { %1417 = vsyncadd [#allocation6], 4294965632  ;;  %v1424_v0 = vmov 0.0   ;;  %vm1425_vm0 = vmmov 0   ;;  %v41_v1 = vld [vmem:[#allocation5 + $0x18] sm:$0xff]  ;;  %v40_v3 = vld [vmem:[#allocation5 + $0x10] sm:$0xff] }
  0x1b   :  { %1167 = vmatprep.subr.mxu0 %v1424_v0  ;;  %1178 = vmatprep.subr.mxu1 %v1424_v0  ;;  %v1456_v2 = vld [vmem:[#allocation5 + $0x38] sm:$0xff]  ;;  %v1459_v4 = vld [vmem:[#allocation5 + $0x30] sm:$0xff]  ;;  %v39_v5 = vld [vmem:[#allocation5 + $0x8] sm:$0xff]  ;;  %vm52_vm1 = vcmask 261120   ;;  %s1426_s0 = smov 32   ;;  %s1427_s1 = smov 64  }
  0x1c   :  { %1175 = vmatprep.mubr.msk.f32.mxu0 %vm1425_vm0, %v1424_v0  ;;  %1186 = vmatprep.mubr.msk.f32.mxu1 %vm1425_vm0, %v1424_v0  ;;  %v1463_v6 = vld [vmem:[#allocation5 + $0x28] sm:$0xff]  ;;  %v38_v7 = vld [vmem:[#allocation5] sm:$0xff]  ;;  %v47_v9 = vld [vmem:[#allocation2] sm:$0xff]  ;;  %vm1059_vm3 = vcmask 122880   ;;  %s1428_s21 = smov [#allocation7]   ;;  %vm1079_vm4 = vcmask 269312  }
  0x1d   :  { %1168 = vmatpush3.msra.mxu0 %v41_v1  ;;  %1179 = vmatpush3.msra.mxu1 %v1456_v2  ;;  %v1468_v8 = vld [vmem:[#allocation5 + $0x20] sm:$0xff]  ;;  %s1088_s22 = sshll.u32 %s1428_s21, 4  ;;  %s1089_s22 = int_to_ptr.vmem [resolvable:$true] %s1088_s22 }
  0x1e   :  { %1169 = vmatprep.subr.mxu0 %v1424_v0  ;;  %1180 = vmatprep.subr.mxu1 %v1424_v0  ;;  %v1098_v10 = vld [vmem:[#allocation5 + $0x60] ss:$0 sm:$0xff]  ;;  %s1394_s23 = scalar_lea.vmem %s1089_s22, 16  ;;  %s1398_s24 = scalar_lea.vmem %s1089_s22, 32 }
  0x1f   :  { %1170 = vmatpush3.msra.mxu0 %v40_v3  ;;  %1181 = vmatpush3.msra.mxu1 %v1459_v4  ;;  %p1395_p10 = scmp.ne.s32.totalorder %s1089_s22, %s1394_s23  ;;  %p1399_p11 = scmp.lt.s32.totalorder %s1089_s22, %s1089_s22 }
  0x20   :  { %1171 = vmatprep.subr.mxu0 %v1424_v0  ;;  %1182 = vmatprep.subr.mxu1 %v1424_v0  ;;  %p1400_p12 = scmp.lt.s32.totalorder %s1398_s24, %s1394_s23 }
  0x21   :  { %1172 = vmatpush3.msra.mxu0 %v39_v5  ;;  %1183 = vmatpush3.msra.mxu1 %v1463_v6 }
  0x22   :  { %1173 = vmatprep.subr.mxu0 %v1424_v0  ;;  %1184 = vmatprep.subr.mxu1 %v1424_v0  ;;  %p1401_p13 = por %p1400_p12, %p1399_p11 }
  0x23   :  { %1174 = vmatpush3.msra.mxu0 %v38_v7  ;;  %1185 = vmatpush3.msra.mxu1 %v1468_v8 }
  0x24   :  { %1176 = vmatmul.mubr.msk.f32.vlgmr.msra.gmra.mxu0 %vm52_vm1, %v47_v9  ;;  %1187 = vmatmul.mubr.f32.vlgmr.msra.gmra.mxu1 %v1424_v0  ;;  %p1402_p0 = pnand %p1401_p13, %p1395_p10 }
  0x25   :  { %1189 = vmatprep.subr.mxu0 %v1424_v0  ;;  %1197 = vmatprep.mubr.msk.f32.mxu0 %vm1425_vm0, %v1424_v0 }
  0x26   :  { %1190 = vmatpush3.msra.mxu0 %v1456_v2  ;;  %1200 = vmatprep.subr.mxu1 %v1424_v0 }
  0x27   :  { %1191 = vmatprep.subr.mxu0 %v1424_v0  ;;  %1201 = vmatpush3.msra.mxu1 %v1456_v2 }
  0x28   :  { %1192 = vmatpush3.msra.mxu0 %v1459_v4  ;;  %1202 = vmatprep.subr.mxu1 %v1424_v0 }
  0x29   :  { %1193 = vmatprep.subr.mxu0 %v1424_v0  ;;  %1203 = vmatpush3.msra.mxu1 %v1459_v4 }
  0x2a   :  { %1194 = vmatpush3.msra.mxu0 %v1463_v6  ;;  %1204 = vmatprep.subr.mxu1 %v1424_v0 }
  0x2b   :  { %1195 = vmatprep.subr.mxu0 %v1424_v0  ;;  %1205 = vmatpush3.msra.mxu1 %v1463_v6 }
  0x2c   :  { %1196 = vmatpush3.msra.mxu0 %v1468_v8  ;;  %1206 = vmatprep.subr.mxu1 %v1424_v0 }
  0x2d   :  { %1207 = vmatpush3.msra.mxu1 %v1468_v8  ;;  %1208 = vmatprep.mubr.msk.f32.mxu1 %vm1425_vm0, %v1424_v0 }
  0x2e   :  { %1211 = vmatprep.subr.mxu0 %v1424_v0  ;;  %1222 = vmatprep.subr.mxu1 %v1424_v0 }
  0xe4   :  { %v122_v11 = vpop.f32.mrf.mxu0  ;;  %v195_v12 = vpop.f32.mrf.mxu1 }
  0xe5   :  { %v1498_v13 = vadd.f32 %v1098_v10, %v122_v11 }
  0xe6   :  { %v1177_v14 = vpop.f32.mrf.mxu0  ;;  %v1188_v15 = vpop.f32.mrf.mxu1 }
  0xe7   :  { %v199_v16 = vadd.f32 %v195_v12, %v1498_v13 }
  0xe9   :  { %1286 = vtanh.f32 %v199_v16  ;;  %v1100_v18 = vmul.f32 -1.442695, %v199_v16 }
  0xeb   :  { %1288 = vpow2.f32 %v1100_v18 }
  0xf6   :  { %v1287_v17 = vpop.eup %1286 }
  0xf7   :  { %209 = vrot.lane.b32.xlu0 %v1287_v17, %s1426_s0 }
  0xf8   :  { %v1289_v19 = vpop.eup %1288 }
  0xf9   :  { %v203_v20 = vadd.f32 1.0, %v1289_v19 }
  0xfb   :  { %1290 = vrcp.f32 %v203_v20 }
 0x108   :  { %v1291_v21 = vpop.eup %1290 }
 0x109   :  { %v207_v24 = vmul.f32 0.0, %v1291_v21 }
 0x169   :  { %v210_v22 = vpop.permute.xlu0 %209 }
 0x16a   :  { %v212_v23 = vmul.f32 %v1291_v21, %v210_v22 }
 0x16c   :  { %214 = vrot.lane.b32.xlu0 %v212_v23, %s1426_s0 }
 0x1de   :  { %v215_v25 = vpop.permute.xlu0 %214 }
 0x1df   :  { %v217_v26 = vadd.f32 %v215_v25, %v207_v24 }
 0x1e1   :  { %1292 = vtanh.f32 %v217_v26  ;;  %v311_v42 = vrot.slane %v217_v26, 7 }
 0x1ee   :  { %v1293_v27 = vpop.eup %1292 }
 0x1ef   :  { %220 = vrot.lane.b32.xlu1 %v1293_v27, %s1426_s0 }
 0x261   :  { %v221_v28 = vpop.permute.xlu1 %220 }
 0x262   :  { %v223_v29 = vmul.f32 %v1291_v21, %v221_v28 }
 0x264   :  { %225 = vrot.lane.b32.xlu1 %v223_v29, %s1427_s1 }
 0x2d6   :  { %v226_v30 = vpop.permute.xlu1 %225 }
 0x2d7   :  { %1198 = vmatmul.mubr.msk.f32.vlgmr.msra.gmra.mxu0 %vm52_vm1, %v226_v30 }
 0x2d8   :  { %1212 = vmatpush3.msra.mxu0 %v1456_v2  ;;  %1219 = vmatprep.mubr.msk.f32.mxu0 %vm1425_vm0, %v1424_v0 }
 0x2d9   :  { %1213 = vmatprep.subr.mxu0 %v1424_v0 }
 0x2da   :  { %1214 = vmatpush3.msra.mxu0 %v1459_v4 }
 0x2db   :  { %1215 = vmatprep.subr.mxu0 %v1424_v0 }
 0x2dc   :  { %1216 = vmatpush3.msra.mxu0 %v1463_v6 }
 0x2dd   :  { %1217 = vmatprep.subr.mxu0 %v1424_v0 }
 0x2de   :  { %1218 = vmatpush3.msra.mxu0 %v1468_v8 }
 0x2df   :  { %1233 = vmatprep.subr.mxu0 %v1424_v0 }
 0x397   :  { %v295_v31 = vpop.f32.mrf.mxu0 }
 0x398   :  { %v300_v32 = vrot.slane %v295_v31, 7 }
 0x399   :  { %v1199_v33 = vpop.f32.mrf.mxu0 }
 0x39a   :  { %v302_v34 = vadd.f32 %v300_v32, %v1498_v13 }
 0x39c   :  { %1294 = vtanh.f32 %v302_v34  ;;  %v1102_v36 = vmul.f32 -1.442695, %v302_v34 }
 0x39e   :  { %1296 = vpow2.f32 %v1102_v36 }
 0x3a9   :  { %v1295_v35 = vpop.eup %1294 }
 0x3aa   :  { %315 = vrot.lane.b32.xlu0 %v1295_v35, %s1426_s0 }
 0x3ab   :  { %v1297_v37 = vpop.eup %1296 }
 0x3ac   :  { %v306_v38 = vadd.f32 1.0, %v1297_v37 }
 0x3ae   :  { %1298 = vrcp.f32 %v306_v38 }
 0x3bb   :  { %v1299_v39 = vpop.eup %1298 }
 0x3bc   :  { %v313_v43 = vmul.f32 %v1299_v39, %v311_v42 }
 0x41c   :  { %v316_v40 = vpop.permute.xlu0 %315 }
 0x41d   :  { %v318_v41 = vmul.f32 %v1299_v39, %v316_v40 }
 0x41f   :  { %320 = vrot.lane.b32.xlu1 %v318_v41, %s1426_s0 }
 0x491   :  { %v321_v44 = vpop.permute.xlu1 %320 }
 0x492   :  { %v323_v45 = vadd.f32 %v321_v44, %v313_v43 }
 0x494   :  { %1300 = vtanh.f32 %v323_v45  ;;  %v418_v62 = vrot.slane %v323_v45, 7 }
 0x4a1   :  { %v1301_v46 = vpop.eup %1300 }
 0x4a2   :  { %326 = vrot.lane.b32.xlu0 %v1301_v46, %s1426_s0 }
 0x514   :  { %v327_v47 = vpop.permute.xlu0 %326 }
 0x515   :  { %v329_v48 = vmul.f32 %v1299_v39, %v327_v47 }
 0x517   :  { %v331_v49 = vrot.slane %v329_v48, 1 }
 0x519   :  { %332 = vrot.lane.b32.xlu1 %v331_v49, %s1427_s1 }
 0x58b   :  { %v333_v50 = vpop.permute.xlu1 %332 }
 0x58c   :  { %1209 = vmatmul.mubr.msk.f32.vlgmr.msra.gmra.mxu1 %vm52_vm1, %v333_v50 }
 0x58d   :  { %1223 = vmatpush3.msra.mxu1 %v1456_v2  ;;  %1230 = vmatprep.mubr.msk.f32.mxu1 %vm1425_vm0, %v1424_v0 }
 0x58e   :  { %1224 = vmatprep.subr.mxu1 %v1424_v0 }
 0x58f   :  { %1225 = vmatpush3.msra.mxu1 %v1459_v4 }
 0x590   :  { %1226 = vmatprep.subr.mxu1 %v1424_v0 }
 0x591   :  { %1227 = vmatpush3.msra.mxu1 %v1463_v6 }
 0x592   :  { %1228 = vmatprep.subr.mxu1 %v1424_v0 }
 0x593   :  { %1229 = vmatpush3.msra.mxu1 %v1468_v8 }
 0x594   :  { %1244 = vmatprep.subr.mxu1 %v1424_v0 }
 0x64c   :  { %v402_v51 = vpop.f32.mrf.mxu1 }
 0x64d   :  { %v407_v52 = vrot.slane %v402_v51, 6 }
 0x64e   :  { %v1210_v53 = vpop.f32.mrf.mxu1 }
 0x64f   :  { %v409_v54 = vadd.f32 %v407_v52, %v1498_v13 }
 0x651   :  { %1302 = vtanh.f32 %v409_v54  ;;  %v1104_v56 = vmul.f32 -1.442695, %v409_v54 }
 0x653   :  { %1304 = vpow2.f32 %v1104_v56 }
 0x65e   :  { %v1303_v55 = vpop.eup %1302 }
 0x65f   :  { %422 = vrot.lane.b32.xlu0 %v1303_v55, %s1426_s0 }
 0x660   :  { %v1305_v57 = vpop.eup %1304 }
 0x661   :  { %v413_v58 = vadd.f32 1.0, %v1305_v57 }
 0x663   :  { %1306 = vrcp.f32 %v413_v58 }
 0x670   :  { %v1307_v59 = vpop.eup %1306 }
 0x671   :  { %v420_v63 = vmul.f32 %v1307_v59, %v418_v62 }
 0x6d1   :  { %v423_v60 = vpop.permute.xlu0 %422 }
 0x6d2   :  { %v425_v61 = vmul.f32 %v1307_v59, %v423_v60 }
 0x6d4   :  { %427 = vrot.lane.b32.xlu1 %v425_v61, %s1426_s0 }
 0x746   :  { %v428_v1 = vpop.permute.xlu1 %427 }
 0x747   :  { %v430_v3 = vadd.f32 %v428_v1, %v420_v63 }
 0x749   :  { %1308 = vtanh.f32 %v430_v3  ;;  %v525_v24 = vrot.slane %v430_v3, 7 }
 0x756   :  { %v1309_v5 = vpop.eup %1308 }
 0x757   :  { %433 = vrot.lane.b32.xlu0 %v1309_v5, %s1426_s0 }
 0x7c9   :  { %v434_v7 = vpop.permute.xlu0 %433 }
 0x7ca   :  { %v436_v9 = vmul.f32 %v1307_v59, %v434_v7 }
 0x7cc   :  { %v438_v10 = vrot.slane %v436_v9, 2 }
 0x7ce   :  { %439 = vrot.lane.b32.xlu1 %v438_v10, %s1427_s1 }
 0x840   :  { %v440_v11 = vpop.permute.xlu1 %439 }
 0x841   :  { %1220 = vmatmul.mubr.msk.f32.vlgmr.msra.gmra.mxu0 %vm52_vm1, %v440_v11 }
 0x842   :  { %1234 = vmatpush3.msra.mxu0 %v1456_v2  ;;  %1241 = vmatprep.mubr.msk.f32.mxu0 %vm1425_vm0, %v1424_v0 }
 0x843   :  { %1235 = vmatprep.subr.mxu0 %v1424_v0 }
 0x844   :  { %1236 = vmatpush3.msra.mxu0 %v1459_v4 }
 0x845   :  { %1237 = vmatprep.subr.mxu0 %v1424_v0 }
 0x846   :  { %1238 = vmatpush3.msra.mxu0 %v1463_v6 }
 0x847   :  { %1239 = vmatprep.subr.mxu0 %v1424_v0 }
 0x848   :  { %1240 = vmatpush3.msra.mxu0 %v1468_v8 }
 0x849   :  { %1255 = vmatprep.subr.mxu0 %v1424_v0 }
 0x901   :  { %v509_v12 = vpop.f32.mrf.mxu0 }
 0x902   :  { %v514_v14 = vrot.slane %v509_v12, 5 }
 0x903   :  { %v1221_v15 = vpop.f32.mrf.mxu0 }
 0x904   :  { %v516_v16 = vadd.f32 %v514_v14, %v1498_v13 }
 0x906   :  { %1310 = vtanh.f32 %v516_v16  ;;  %v1106_v18 = vmul.f32 -1.442695, %v516_v16 }
 0x908   :  { %1312 = vpow2.f32 %v1106_v18 }
 0x913   :  { %v1311_v17 = vpop.eup %1310 }
 0x914   :  { %529 = vrot.lane.b32.xlu0 %v1311_v17, %s1426_s0 }
 0x915   :  { %v1313_v19 = vpop.eup %1312 }
 0x916   :  { %v520_v20 = vadd.f32 1.0, %v1313_v19 }
 0x918   :  { %1314 = vrcp.f32 %v520_v20 }
 0x925   :  { %v1315_v21 = vpop.eup %1314 }
 0x926   :  { %v527_v25 = vmul.f32 %v1315_v21, %v525_v24 }
 0x986   :  { %v530_v22 = vpop.permute.xlu0 %529 }
 0x987   :  { %v532_v23 = vmul.f32 %v1315_v21, %v530_v22 }
 0x989   :  { %534 = vrot.lane.b32.xlu1 %v532_v23, %s1426_s0 }
 0x9fb   :  { %v535_v26 = vpop.permute.xlu1 %534 }
 0x9fc   :  { %v537_v27 = vadd.f32 %v535_v26, %v527_v25 }
 0x9fe   :  { %1316 = vtanh.f32 %v537_v27  ;;  %v632_v44 = vrot.slane %v537_v27, 7 }
 0xa0b   :  { %v1317_v28 = vpop.eup %1316 }
 0xa0c   :  { %540 = vrot.lane.b32.xlu0 %v1317_v28, %s1426_s0 }
 0xa7e   :  { %v541_v29 = vpop.permute.xlu0 %540 }
 0xa7f   :  { %v543_v30 = vmul.f32 %v1315_v21, %v541_v29 }
 0xa81   :  { %v545_v31 = vrot.slane %v543_v30, 3 }
 0xa83   :  { %546 = vrot.lane.b32.xlu1 %v545_v31, %s1427_s1 }
 0xaf5   :  { %v547_v32 = vpop.permute.xlu1 %546 }
 0xaf6   :  { %1231 = vmatmul.mubr.msk.f32.vlgmr.msra.gmra.mxu1 %vm52_vm1, %v547_v32 }
 0xaf7   :  { %1245 = vmatpush3.msra.mxu1 %v1456_v2  ;;  %1252 = vmatprep.mubr.msk.f32.mxu1 %vm1425_vm0, %v1424_v0 }
 0xaf8   :  { %1246 = vmatprep.subr.mxu1 %v1424_v0 }
 0xaf9   :  { %1247 = vmatpush3.msra.mxu1 %v1459_v4 }
 0xafa   :  { %1248 = vmatprep.subr.mxu1 %v1424_v0 }
 0xafb   :  { %1249 = vmatpush3.msra.mxu1 %v1463_v6 }
 0xafc   :  { %1250 = vmatprep.subr.mxu1 %v1424_v0 }
 0xafd   :  { %1251 = vmatpush3.msra.mxu1 %v1468_v8 }
 0xafe   :  { %1266 = vmatprep.subr.mxu1 %v1424_v0 }
 0xbb6   :  { %v616_v33 = vpop.f32.mrf.mxu1 }
 0xbb7   :  { %v621_v34 = vrot.slane %v616_v33, 4 }
 0xbb8   :  { %v1232_v35 = vpop.f32.mrf.mxu1 }
 0xbb9   :  { %v623_v36 = vadd.f32 %v621_v34, %v1498_v13 }
 0xbbb   :  { %1318 = vtanh.f32 %v623_v36  ;;  %v1108_v38 = vmul.f32 -1.442695, %v623_v36 }
 0xbbd   :  { %1320 = vpow2.f32 %v1108_v38 }
 0xbc8   :  { %v1319_v37 = vpop.eup %1318 }
 0xbc9   :  { %636 = vrot.lane.b32.xlu0 %v1319_v37, %s1426_s0 }
 0xbca   :  { %v1321_v39 = vpop.eup %1320 }
 0xbcb   :  { %v627_v40 = vadd.f32 1.0, %v1321_v39 }
 0xbcd   :  { %1322 = vrcp.f32 %v627_v40 }
 0xbda   :  { %v1323_v41 = vpop.eup %1322 }
 0xbdb   :  { %v634_v45 = vmul.f32 %v1323_v41, %v632_v44 }
 0xc3b   :  { %v637_v42 = vpop.permute.xlu0 %636 }
 0xc3c   :  { %v639_v43 = vmul.f32 %v1323_v41, %v637_v42 }
 0xc3e   :  { %641 = vrot.lane.b32.xlu1 %v639_v43, %s1426_s0 }
 0xcb0   :  { %v642_v46 = vpop.permute.xlu1 %641 }
 0xcb1   :  { %v644_v47 = vadd.f32 %v642_v46, %v634_v45  ;;  %v974_v46 = vld [vmem:[#allocation5 + $0x50] sm:$0xff] }
 0xcb3   :  { %1324 = vtanh.f32 %v644_v47 }
 0xcc0   :  { %v1325_v48 = vpop.eup %1324 }
 0xcc1   :  { %647 = vrot.lane.b32.xlu0 %v1325_v48, %s1426_s0 }
 0xd33   :  { %v648_v49 = vpop.permute.xlu0 %647 }
 0xd34   :  { %v650_v50 = vmul.f32 %v1323_v41, %v648_v49  ;;  %v972_v49 = vld [vmem:[#allocation5 + $0x40] sm:$0xff] }
 0xd36   :  { %v652_v51 = vrot.slane %v650_v50, 4 }
 0xd38   :  { %653 = vrot.lane.b32.xlu1 %v652_v51, %s1427_s1 }
 0xdaa   :  { %v654_v52 = vpop.permute.xlu1 %653 }
 0xdab   :  { %1242 = vmatmul.mubr.msk.f32.vlgmr.msra.gmra.mxu0 %vm52_vm1, %v654_v52 }
 0xdac   :  { %1256 = vmatpush3.msra.mxu0 %v1456_v2  ;;  %1263 = vmatprep.mubr.msk.f32.mxu0 %vm1425_vm0, %v1424_v0 }
 0xdad   :  { %1257 = vmatprep.subr.mxu0 %v1424_v0 }
 0xdae   :  { %1258 = vmatpush3.msra.mxu0 %v1459_v4 }
 0xdaf   :  { %1259 = vmatprep.subr.mxu0 %v1424_v0 }
 0xdb0   :  { %1260 = vmatpush3.msra.mxu0 %v1463_v6 }
 0xdb1   :  { %1261 = vmatprep.subr.mxu0 %v1424_v0 }
 0xdb2   :  { %1262 = vmatpush3.msra.mxu0 %v1468_v8  ;;  %v739_v8 = vrot.slane %v644_v47, 7  ;;  %v973_v47 = vld [vmem:[#allocation5 + $0x48] sm:$0xff] }
 0xe6b   :  { %v723_v53 = vpop.f32.mrf.mxu0 }
 0xe6c   :  { %v728_v54 = vrot.slane %v723_v53, 3 }
 0xe6d   :  { %v1243_v55 = vpop.f32.mrf.mxu0 }
 0xe6e   :  { %v730_v2 = vadd.f32 %v728_v54, %v1498_v13  ;;  %v976_v54 = vld [vmem:[#allocation5 + $0x61] sm:$0x1] }
 0xe70   :  { %1326 = vtanh.f32 %v730_v2  ;;  %v1110_v57 = vmul.f32 -1.442695, %v730_v2 }
 0xe72   :  { %1328 = vpow2.f32 %v1110_v57 }
 0xe7d   :  { %v1327_v56 = vpop.eup %1326 }
 0xe7e   :  { %743 = vrot.lane.b32.xlu0 %v1327_v56, %s1426_s0 }
 0xe7f   :  { %v1329_v4 = vpop.eup %1328 }
 0xe80   :  { %v734_v58 = vadd.f32 1.0, %v1329_v4  ;;  %v977_v4 = vld [vmem:[#allocation5 + $0x62] sm:$0x1] }
 0xe82   :  { %1330 = vrcp.f32 %v734_v58 }
 0xe8f   :  { %v1331_v59 = vpop.eup %1330 }
 0xe90   :  { %v741_v61 = vmul.f32 %v1331_v59, %v739_v8 }
 0xef0   :  { %v744_v6 = vpop.permute.xlu0 %743 }
 0xef1   :  { %v746_v60 = vmul.f32 %v1331_v59, %v744_v6  ;;  %v978_v6 = vld [vmem:[#allocation5 + $0x63] sm:$0x1] }
 0xef3   :  { %748 = vrot.lane.b32.xlu1 %v746_v60, %s1426_s0 }
 0xf65   :  { %v749_v62 = vpop.permute.xlu1 %748 }
 0xf66   :  { %v751_v63 = vadd.f32 %v749_v62, %v741_v61 }
 0xf68   :  { %1332 = vtanh.f32 %v751_v63  ;;  %v846_v22 = vrot.slane %v751_v63, 7 }
 0xf75   :  { %v1333_v1 = vpop.eup %1332 }
 0xf76   :  { %754 = vrot.lane.b32.xlu0 %v1333_v1, %s1426_s0 }
 0xfe8   :  { %v755_v3 = vpop.permute.xlu0 %754 }
 0xfe9   :  { %v757_v5 = vmul.f32 %v1331_v59, %v755_v3 }
 0xfeb   :  { %v759_v7 = vrot.slane %v757_v5, 5 }
 0xfed   :  { %760 = vrot.lane.b32.xlu1 %v759_v7, %s1427_s1 }
0x105f   :  { %v761_v9 = vpop.permute.xlu1 %760 }
0x1060   :  { %1253 = vmatmul.mubr.msk.f32.vlgmr.msra.gmra.mxu1 %vm52_vm1, %v761_v9 }
0x1061   :  { %1274 = vmatprep.mubr.msk.f32.mxu1 %vm1425_vm0, %v1424_v0 }
0x1120   :  { %v830_v10 = vpop.f32.mrf.mxu1 }
0x1121   :  { %v835_v11 = vrot.slane %v830_v10, 2 }
0x1122   :  { %v1254_v12 = vpop.f32.mrf.mxu1 }
0x1123   :  { %v837_v14 = vadd.f32 %v835_v11, %v1498_v13 }
0x1125   :  { %1334 = vtanh.f32 %v837_v14  ;;  %v1112_v16 = vmul.f32 -1.442695, %v837_v14 }
0x1127   :  { %1336 = vpow2.f32 %v1112_v16 }
0x1132   :  { %v1335_v15 = vpop.eup %1334 }
0x1133   :  { %850 = vrot.lane.b32.xlu0 %v1335_v15, %s1426_s0 }
0x1134   :  { %v1337_v17 = vpop.eup %1336 }
0x1135   :  { %v841_v18 = vadd.f32 1.0, %v1337_v17 }
0x1137   :  { %1338 = vrcp.f32 %v841_v18 }
0x1144   :  { %v1339_v19 = vpop.eup %1338 }
0x1145   :  { %v848_v23 = vmul.f32 %v1339_v19, %v846_v22 }
0x11a5   :  { %v851_v20 = vpop.permute.xlu0 %850 }
0x11a6   :  { %v853_v21 = vmul.f32 %v1339_v19, %v851_v20 }
0x11a8   :  { %855 = vrot.lane.b32.xlu1 %v853_v21, %s1426_s0 }
0x121a   :  { %v856_v24 = vpop.permute.xlu1 %855 }
0x121b   :  { %v858_v25 = vadd.f32 %v856_v24, %v848_v23 }
0x121d   :  { %1340 = vtanh.f32 %v858_v25  ;;  %v953_v42 = vrot.slane %v858_v25, 7 }
0x122a   :  { %v1341_v26 = vpop.eup %1340 }
0x122b   :  { %861 = vrot.lane.b32.xlu0 %v1341_v26, %s1426_s0 }
0x129d   :  { %v862_v27 = vpop.permute.xlu0 %861 }
0x129e   :  { %v864_v28 = vmul.f32 %v1339_v19, %v862_v27 }
0x12a0   :  { %v866_v29 = vrot.slane %v864_v28, 6 }
0x12a2   :  { %867 = vrot.lane.b32.xlu1 %v866_v29, %s1427_s1 }
0x1314   :  { %v868_v30 = vpop.permute.xlu1 %867 }
0x1315   :  { %1264 = vmatmul.mubr.msk.f32.vlgmr.msra.gmra.mxu0 %vm52_vm1, %v868_v30 }
0x13d5   :  { %v937_v31 = vpop.f32.mrf.mxu0 }
0x13d6   :  { %v942_v32 = vrot.slane %v937_v31, 1 }
0x13d7   :  { %v1265_v33 = vpop.f32.mrf.mxu0 }
0x13d8   :  { %v944_v34 = vadd.f32 %v942_v32, %v1498_v13  ;;  %v975_v13 = vld [vmem:[#allocation5 + $0x58] sm:$0xff] }
0x13d9   :  { %1267 = vmatpush3.msra.mxu1 %v975_v13 }
0x13da   :  { %1342 = vtanh.f32 %v944_v34  ;;  %v1114_v36 = vmul.f32 -1.442695, %v944_v34  ;;  %1268 = vmatprep.subr.mxu1 %v1424_v0 }
0x13db   :  { %1269 = vmatpush3.msra.mxu1 %v974_v46 }
0x13dc   :  { %1344 = vpow2.f32 %v1114_v36  ;;  %1270 = vmatprep.subr.mxu1 %v1424_v0 }
0x13dd   :  { %1271 = vmatpush3.msra.mxu1 %v973_v47 }
0x13de   :  { %1272 = vmatprep.subr.mxu1 %v1424_v0 }
0x13df   :  { %1273 = vmatpush3.msra.mxu1 %v972_v49 }
0x13e7   :  { %v1343_v35 = vpop.eup %1342 }
0x13e8   :  { %957 = vrot.lane.b32.xlu0 %v1343_v35, %s1426_s0 }
0x13e9   :  { %v1345_v37 = vpop.eup %1344 }
0x13ea   :  { %v948_v38 = vadd.f32 1.0, %v1345_v37 }
0x13ec   :  { %1346 = vrcp.f32 %v948_v38 }
0x13f9   :  { %v1347_v39 = vpop.eup %1346 }
0x13fa   :  { %v955_v43 = vmul.f32 %v1347_v39, %v953_v42 }
0x145a   :  { %v958_v40 = vpop.permute.xlu0 %957 }
0x145b   :  { %v960_v41 = vmul.f32 %v1347_v39, %v958_v40 }
0x145d   :  { %962 = vrot.lane.b32.xlu1 %v960_v41, %s1426_s0 }
0x14cf   :  { %v963_v44 = vpop.permute.xlu1 %962 }
0x14d0   :  { %v965_v45 = vadd.f32 %v963_v44, %v955_v43 }
0x14d2   :  { %1348 = vtanh.f32 %v965_v45 }
0x14df   :  { %v1349_v48 = vpop.eup %1348 }
0x14e0   :  { %968 = vrot.lane.b32.xlu0 %v1349_v48, %s1426_s0 }
0x1552   :  { %v969_v50 = vpop.permute.xlu0 %968 }
0x1553   :  { %v971_v51 = vmul.f32 %v1347_v39, %v969_v50 }
0x1555   :  { %v980_v52 = vrot.slane %v971_v51, 7 }
0x1557   :  { %981 = vrot.lane.b32.xlu1 %v980_v52, %s1427_s1 }
0x155b   :  { %1070 = vrot.lane.b32.xlu1 %v971_v51, %s1427_s1 }
0x15c9   :  { %v982_v53 = vpop.permute.xlu1 %981 }
0x15ca   :  { %1275 = vmatmul.mubr.msk.f32.vlgmr.msra.gmra.mxu1 %vm52_vm1, %v982_v53 }
0x15cd   :  { %v1071_v5 = vpop.permute.xlu1 %1070 }
0x168a   :  { %v1051_v55 = vpop.f32.mrf.mxu1 }
0x168b   :  { %v1052_v2 = vadd.f32 %v1051_v55, %v976_v54 }
0x168c   :  { %v1276_v56 = vpop.f32.mrf.mxu1 }
0x168d   :  { %vm1055_vm2 = vcmp.ge.f32.partialorder %v1052_v2, 0.0  ;;  %v1056_v57 = vmul.f32 0.2, %v1052_v2 }
0x168f   :  { %v1057_v58 = vsel %vm1055_vm2, %v1052_v2, %v1056_v57 }
0x1690   :  { %v1058_v0 = vmul.f32 %v1057_v58, %v977_v4 }
0x1692   :  { %v1060_v59 = vsel %vm1059_vm3, %v1058_v0, 0.0 }
0x1693   :  { %1061 = vadd.xlane.f32.xlu0 %v1060_v59 }
0x171c   :  { %v1062_v60 = vpop.xlane.xlu0 %1061 }
0x171d   :  { %v1063_v8 = vadd.f32 %v1062_v60, %v978_v6 }
0x171f   :  { %v1116_v61 = vmul.f32 -1.442695, %v1063_v8 }
0x1721   :  { %1350 = vpow2.f32 %v1116_v61 }
0x172e   :  { %v1351_v62 = vpop.eup %1350 }
0x172f   :  { %v1067_v63 = vadd.f32 1.0, %v1351_v62 }
0x1731   :  { %1352 = vrcp.f32 %v1067_v63 }
0x173e   :  { %v1353_v1 = vpop.eup %1352 }
0x173f   :  { %v1074_v3 = vrot.slane %v1353_v1, 1 }
0x1741   :  { %1075 = vrot.lane.b32.xlu1 %v1074_v3, %s1426_s0 }
0x17b3   :  { %v1076_v7 = vpop.permute.xlu1 %1075 }
0x17b4   :  { %v1078_v9 = vsel %vm52_vm1, %v1071_v5, %v1076_v7 }
0x17b5   :  { %v1080_v10 = vsel %vm1079_vm4, %v1078_v9, 0.0 }
0x17b6   :  { %1081 = vst [vmem:[#allocation7 - $0x7] sm:$0x80] %v1080_v10 }
0x17b7   :  { %1405 = shalt.err (!%p1402_p0)
}
0x17b8   :  { %1091 = dma.vmem_to_hbm [thread:$0]  %s1089_s22, 16, %s1610_s2, [#allocation4]  }
0x17b9   :  { %1418 = dma.done.wait [#allocation4], 16  }
0x17ba   :  { %1419 = vsyncadd [#allocation4], 4294967280 }
0x17bb   :  { %1095 = vsyncpa [#allocation3], 1 }
0x17bc   :  { %1096 = vsyncpa [#allocation6], 1 }
0x17bd   :  { %1097 = vsyncpa [#allocation4], 1 }

</bundles_post_ra>
